<compile_context>
chip_gen: v7x
topology: tpu7x:2x2x1
jax: 0.10.0
libtpu: 0.0.40
codegen_flags: <defaults>
</compile_context>

<pallas_src>
import functools

import numpy as np
import jax
import jax.numpy as jnp
from jax.experimental import pallas as pl
from jax.experimental.pallas import tpu as pltpu

MAX_UNIT_SIZE = 800   # HeadcountEffect default
LANE = 128            # TPU lane width
SUB = 8               # TPU sublane granularity
SUB_TILE = 64         # sublane rows per grid step (VPU path) -> 8192 batch/step
LANE_TILE = 4096      # lanes per grid step (MXU fallback path)
VPU_MAX_UNITS = 32    # above this, the unrolled VPU quadratic form is too big


def _round_up(x, m):
    return ((x + m - 1) // m) * m


# ----------------------------- helpers (same semantics as PyTorch) -----------
def combinations(team_size):
    i1, i2 = [], []
    for i in range(team_size):
        for j in range(team_size):
            if i == j:
                continue
            i1.append(i)
            i2.append(j)
    return i1, i2


# ----------------------------- Pallas kernels --------------------------------
def _coop_kernel_vpu(n_unit, indi, coop, m_ref, x_ref, out_ref):
    """Small-n_unit path. Batch is 2-D (sublanes x lanes) -> pure VPU work.

    m_ref:   SMEM (n_unit, n_unit)  pair-MLP matrix (scalars)
    x_ref:   VMEM (n_comp, n_unit, TR, 128)  pre-relu, skill/mask folded
    out_ref: VMEM (TR, 128)  team_skill + order2, fully dense stores
    """
    acc = jnp.zeros(out_ref.shape, jnp.float32)

    if indi:
        # team_skill = sum_u relu(softplus(skill_u) * mask * embed)
        for u in range(n_unit):
            acc = acc + jnp.maximum(x_ref[0, u], 0.0)

    if coop:
        c = 1 if indi else 0
        nu = [jnp.maximum(x_ref[c, u], 0.0) for u in range(n_unit)]
        # order2 = sum_{i != j} M[i,j] nu_i nu_j = sum_{i<j} (M[i,j]+M[j,i]) nu_i nu_j
        q = None
        for i in range(n_unit):
            for j in range(i + 1, n_unit):
                s_ij = m_ref[i, j] + m_ref[j, i]        # SMEM scalar reads
                t = s_ij * (nu[i] * nu[j])              # broadcast scalar FMA
                q = t if q is None else q + t
        acc = acc + q

    out_ref[...] = acc


def _coop_kernel_mxu(n_unit, indi, coop, m_ref, x_ref, out_ref):
    """Large-n_unit fallback. Batch on lanes, quadratic form on the MXU.

    m_ref:   VMEM (n_unit, n_unit)   zero diagonal
    x_ref:   VMEM (n_comp, n_unit, TB)
    out_ref: VMEM (1, TB)
    """
    acc = jnp.zeros(out_ref.shape, jnp.float32)
    if indi:
        xi = jnp.maximum(x_ref[0], 0.0)                             # (n_unit, TB)
        acc = acc + jnp.sum(xi, axis=0, keepdims=True)
    if coop:
        nu = jnp.maximum(x_ref[1 if indi else 0], 0.0)              # (n_unit, TB)
        y = jnp.dot(m_ref[...], nu, preferred_element_type=jnp.float32)
        acc = acc + jnp.sum(nu * y, axis=0, keepdims=True)
    out_ref[...] = acc


# ----------------------------- pallas_call wrappers ---------------------------
def _forward_vpu(m_mat, x2, n_unit, indi, coop, batch):
    n_comp = x2.shape[0]
    pb = _round_up(batch, LANE)
    r = pb // LANE
    if r <= SUB_TILE:
        tr, r_pad, n_steps = r, r, 1                   # one fat step
    else:
        # even number of steps -> dual-TC sharding on v7x; harmless on v5e/v6e
        n_steps = _round_up(pl.cdiv(r, SUB_TILE), 2)
        tr = _round_up(pl.cdiv(r, n_steps), SUB)
        r_pad = tr * n_steps
    total = r_pad * LANE
    if total != batch:
        x2 = jnp.pad(x2, ((0, 0), (0, 0), (0, total - batch)))  # zero-pad: exact
    x4 = x2.reshape(n_comp, n_unit, r_pad, LANE)

    kernel = functools.partial(_coop_kernel_vpu, n_unit, indi, coop)
    out = pl.pallas_call(
        kernel,
        grid=(n_steps,),
        in_specs=[
            pl.BlockSpec(memory_space=pltpu.MemorySpace.SMEM),        # M scalars
            pl.BlockSpec((n_comp, n_unit, tr, LANE), lambda i: (0, 0, i, 0)),
        ],
        out_specs=pl.BlockSpec((tr, LANE), lambda i: (i, 0)),
        out_shape=jax.ShapeDtypeStruct((r_pad, LANE), jnp.float32),
        compiler_params=pltpu.CompilerParams(
            dimension_semantics=("parallel",)),
    )(m_mat, x4)
    return out.reshape(-1)[:batch]


def _forward_mxu(m_mat, x2, n_unit, indi, coop, batch):
    n_comp = x2.shape[0]
    pb = _round_up(batch, LANE)
    if pb <= LANE_TILE:
        tb, pb2, n_steps = pb, pb, 1
    else:
        n_steps = _round_up(pl.cdiv(pb, LANE_TILE), 2)
        tb = _round_up(pl.cdiv(pb, n_steps), LANE)
        pb2 = tb * n_steps
    if pb2 != batch:
        x2 = jnp.pad(x2, ((0, 0), (0, 0), (0, pb2 - batch)))

    kernel = functools.partial(_coop_kernel_mxu, n_unit, indi, coop)
    out = pl.pallas_call(
        kernel,
        grid=(n_steps,),
        in_specs=[
            pl.BlockSpec((n_unit, n_unit), lambda i: (0, 0)),
            pl.BlockSpec((n_comp, n_unit, tb), lambda i: (0, 0, i)),
        ],
        out_specs=pl.BlockSpec((1, tb), lambda i: (0, i)),
        out_shape=jax.ShapeDtypeStruct((1, pb2), jnp.float32),
        compiler_params=pltpu.CompilerParams(
            dimension_semantics=("parallel",)),
    )(m_mat, x2)
    return out[0, :batch]


# ----------------------------- forward ----------------------------------------
@functools.partial(jax.jit,
                   static_argnames=("n_unit", "hidden_dim", "indi", "coop",
                                    "force_mxu"))
def cooperation_forward(params, unit_nums, n_unit, hidden_dim,
                        indi=True, coop=True, force_mxu=False):
    unit_nums = unit_nums.astype(jnp.int32)
    batch = unit_nums.shape[0]
    if not (indi or coop):
        return jnp.zeros((batch,), jnp.float32)

    idx1, idx2 = combinations(n_unit)

    # ---- batch-independent precompute (hoisted out of the kernel) ----
    # Pair MLP: Linear(H,64) -> ReLU -> Dropout -> Linear(64,1) -> ReLU
    # TODO(synk): Dropout(0.2) is treated as eval-mode identity (inference path).
    if coop:
        i1 = jnp.asarray(idx1, jnp.int32)
        i2 = jnp.asarray(idx2, jnp.int32)
        emb = params["emb"]                                          # (n_unit, H)
        ab = emb[i1] * emb[i2]                                       # (P, H)
        h = jnp.maximum(ab @ params["w1"] + params["b1"][None, :], 0.0)
        pair = jnp.maximum(h @ params["w2"] + params["b2"][None, :], 0.0)[:, 0]
        # M[i, j] = pair(i, j) for i != j, 0 on the diagonal.
        m_mat = jnp.zeros((n_unit, n_unit), jnp.float32).at[i1, i2].set(pair)
    else:
        m_mat = jnp.zeros((n_unit, n_unit), jnp.float32)

    # ---- batch-dependent glue: one fused gather, directly in (n_unit, B) ----
    nums_t = unit_nums.T                                             # (n_unit, B)
    shift = (jnp.arange(n_unit, dtype=jnp.int32) * MAX_UNIT_SIZE)[:, None]
    ids_t = nums_t + shift                                           # (n_unit, B)
    mask_t = (nums_t != 0).astype(jnp.float32)                       # (n_unit, B)

    if indi and coop:
        g = params["tables"][:, ids_t]                               # (2, n_unit, B)
        skill = jax.nn.softplus(params["skill_w"]).reshape(n_unit, 1)
        # softplus(skill) > 0 and mask in {0,1} commute with the in-kernel relu.
        scale = jnp.stack([skill * mask_t, mask_t])                  # (2, n_unit, B)
        x2 = g * scale
    elif indi:
        skill = jax.nn.softplus(params["skill_w"]).reshape(n_unit, 1)
        x2 = (params["tables"][0][ids_t] * (skill * mask_t))[None]   # (1, n_unit, B)
    else:
        x2 = (params["tables"][1][ids_t] * mask_t)[None]             # (1, n_unit, B)

    use_mxu = force_mxu or (n_unit > VPU_MAX_UNITS)
    if use_mxu:
        return _forward_mxu(m_mat, x2, n_unit, indi, coop, batch)
    return _forward_vpu(m_mat, x2, n_unit, indi, coop, batch)


# ----------------------------- parameter init ---------------------------------
def init_params(key, n_unit, hidden_dim):
    ks = jax.random.split(key, 7)
    p = {}
    p["skill_w"] = 0.5 * jax.random.normal(ks[0], (n_unit, 1), jnp.float32)
    p["emb"] = 0.5 * jax.random.normal(ks[1], (n_unit, hidden_dim), jnp.float32)
    lim1 = 1.0 / np.sqrt(hidden_dim)
    p["w1"] = jax.random.uniform(ks[2], (hidden_dim, 64), jnp.float32, -lim1, lim1)
    p["b1"] = jax.random.uniform(ks[3], (64,), jnp.float32, -lim1, lim1)
    lim2 = 1.0 / np.sqrt(64)
    p["w2"] = jax.random.uniform(ks[4], (64, 1), jnp.float32, -lim2, lim2)
    p["b2"] = jax.random.uniform(ks[5], (1,), jnp.float32, -lim2, lim2)
    # HeadcountEffect.__init__ sets every entry to 0.5; perturb around it so the
    # relu / mask paths are actually exercised numerically. tables[0]=indi, [1]=coop.
    p["tables"] = 0.5 + 0.6 * jax.random.normal(
        ks[6], (2, n_unit * MAX_UNIT_SIZE), jnp.float32)
    return p


# ----------------------------- pure-JAX reference ------------------------------
def cooperation_ref(params, unit_nums, n_unit, indi=True, coop=True):
    idx1, idx2 = combinations(n_unit)
    i1 = jnp.asarray(idx1)
    i2 = jnp.asarray(idx2)
    mask = (unit_nums != 0).astype(jnp.float32)
    shift = (jnp.arange(n_unit) * MAX_UNIT_SIZE)[None, :]
    ids = unit_nums + shift
    out = jnp.zeros((unit_nums.shape[0],), jnp.float32)
    if indi:
        skill = jax.nn.softplus(params["skill_w"]).reshape(1, n_unit)
        nu_i = jnp.maximum(params["tables"][0][ids], 0.0) * mask
        out = out + (skill * nu_i).sum(axis=1)
    if coop:
        emb = params["emb"]
        ab = emb[i1] * emb[i2]
        h = jnp.maximum(ab @ params["w1"] + params["b1"], 0.0)
        pair = jnp.maximum(h @ params["w2"] + params["b2"], 0.0)[:, 0]
        nu_c = jnp.maximum(params["tables"][1][ids], 0.0) * mask
        out = out + (pair[None, :] * nu_c[:, i1] * nu_c[:, i2]).sum(-1)
    return out


# ----------------------------- main --------------------------------------------
if __name__ == "__main__":
    n_unit, hidden_dim, batch = 6, 32, 8
    key = jax.random.PRNGKey(0)
    kp, kx = jax.random.split(key)
    params = init_params(kp, n_unit, hidden_dim)
    # unit counts in [0, 7); zeros exercise the (unit_nums != 0) mask
    unit_nums = jax.random.randint(kx, (batch, n_unit), 0, 7, dtype=jnp.int32)

    out = jax.block_until_ready(
        cooperation_forward(params, unit_nums, n_unit, hidden_dim,
                            indi=True, coop=True))
    ref = cooperation_ref(params, unit_nums, n_unit, indi=True, coop=True)
    np.testing.assert_allclose(np.asarray(out), np.asarray(ref),
                               rtol=1e-5, atol=1e-5)

    # batch padding path: 700 -> 768 (multiple of 128), single fat grid step.
    un_b = jax.random.randint(jax.random.PRNGKey(1), (700, n_unit), 0, 7,
                              dtype=jnp.int32)
    out_b = jax.block_until_ready(
        cooperation_forward(params, un_b, n_unit, hidden_dim))
    ref_b = cooperation_ref(params, un_b, n_unit)
    np.testing.assert_allclose(np.asarray(out_b), np.asarray(ref_b),
                               rtol=1e-5, atol=1e-5)

    # multi-step even grid path: 8492 -> 67 sublane rows -> 2 steps of 40 rows.
    un_c = jax.random.randint(jax.random.PRNGKey(2), (8492, n_unit), 0, 7,
                              dtype=jnp.int32)
    out_c = jax.block_until_ready(
        cooperation_forward(params, un_c, n_unit, hidden_dim))
    ref_c = cooperation_ref(params, un_c, n_unit)
    np.testing.assert_allclose(np.asarray(out_c), np.asarray(ref_c),
                               rtol=1e-5, atol=1e-5)

    # indi-only / coop-only branches
    out_i = jax.block_until_ready(
        cooperation_forward(params, unit_nums, n_unit, hidden_dim,
                            indi=True, coop=False))
    np.testing.assert_allclose(
        np.asarray(out_i),
        np.asarray(cooperation_ref(params, unit_nums, n_unit, True, False)),
        rtol=1e-5, atol=1e-5)
    out_o = jax.block_until_ready(
        cooperation_forward(params, unit_nums, n_unit, hidden_dim,
                            indi=False, coop=True))
    np.testing.assert_allclose(
        np.asarray(out_o),
        np.asarray(cooperation_ref(params, unit_nums, n_unit, False, True)),
        rtol=1e-5, atol=1e-5)

    # large-n_unit MXU fallback, forced at n_unit=6 so the path is exercised.
    # (default TPU f32 matmul precision is bf16-based -> looser tolerance here)
    out_m = jax.block_until_ready(
        cooperation_forward(params, un_b, n_unit, hidden_dim, force_mxu=True))
    np.testing.assert_allclose(np.asarray(out_m), np.asarray(ref_b),
                               rtol=2e-2, atol=2e-2)

    print("KERNEL_OK")
</pallas_src>

<mosaic_0001>
module attributes {stable_mosaic.version = 11 : i64} {
  func.func @_coop_kernel_vpu(%arg0: i32, %arg1: memref<6x6xf32, #tpu.memory_space<smem>>, %arg2: memref<2x6x1x128xf32, #tpu.memory_space<vmem>>, %arg3: memref<1x128xf32, #tpu.memory_space<vmem>>) attributes {dimension_semantics = [#tpu.dimension_semantics<parallel>], iteration_bounds = array<i64: 1>, scalar_prefetch = 0 : i64, scratch_operands = 0 : i64, tpu.core_type = #tpu.core_type<tc>, window_params = [{transform_indices = @transform_0, window_bounds = array<i64: 6, 6>}, {transform_indices = @transform_1, window_bounds = array<i64: 2, 6, 1, 128>}, {transform_indices = @transform_2, window_bounds = array<i64: 1, 128>}]} {
    %cst = arith.constant 0.000000e+00 : f32
    %0 = vector.broadcast %cst : f32 to vector<1x128xf32>
    %c0 = arith.constant 0 : index
    %c0_0 = arith.constant 0 : index
    %c0_1 = arith.constant 0 : index
    %c0_2 = arith.constant 0 : index
    %1 = vector.load %arg2[%c0, %c0_0, %c0_1, %c0_2] : memref<2x6x1x128xf32, #tpu.memory_space<vmem>>, vector<1x1x1x128xf32>
    %2 = vector.shape_cast %1 : vector<1x1x1x128xf32> to vector<1x128xf32>
    %cst_3 = arith.constant 0.000000e+00 : f32
    %3 = vector.broadcast %cst_3 : f32 to vector<1x128xf32>
    %4 = arith.maximumf %2, %3 : vector<1x128xf32>
    %5 = arith.addf %0, %4 : vector<1x128xf32>
    %c0_4 = arith.constant 0 : index
    %c1 = arith.constant 1 : index
    %c0_5 = arith.constant 0 : index
    %c0_6 = arith.constant 0 : index
    %6 = vector.load %arg2[%c0_4, %c1, %c0_5, %c0_6] : memref<2x6x1x128xf32, #tpu.memory_space<vmem>>, vector<1x1x1x128xf32>
    %7 = vector.shape_cast %6 : vector<1x1x1x128xf32> to vector<1x128xf32>
    %cst_7 = arith.constant 0.000000e+00 : f32
    %8 = vector.broadcast %cst_7 : f32 to vector<1x128xf32>
    %9 = arith.maximumf %7, %8 : vector<1x128xf32>
    %10 = arith.addf %5, %9 : vector<1x128xf32>
    %c0_8 = arith.constant 0 : index
    %c2 = arith.constant 2 : index
    %c0_9 = arith.constant 0 : index
    %c0_10 = arith.constant 0 : index
    %11 = vector.load %arg2[%c0_8, %c2, %c0_9, %c0_10] : memref<2x6x1x128xf32, #tpu.memory_space<vmem>>, vector<1x1x1x128xf32>
    %12 = vector.shape_cast %11 : vector<1x1x1x128xf32> to vector<1x128xf32>
    %cst_11 = arith.constant 0.000000e+00 : f32
    %13 = vector.broadcast %cst_11 : f32 to vector<1x128xf32>
    %14 = arith.maximumf %12, %13 : vector<1x128xf32>
    %15 = arith.addf %10, %14 : vector<1x128xf32>
    %c0_12 = arith.constant 0 : index
    %c3 = arith.constant 3 : index
    %c0_13 = arith.constant 0 : index
    %c0_14 = arith.constant 0 : index
    %16 = vector.load %arg2[%c0_12, %c3, %c0_13, %c0_14] : memref<2x6x1x128xf32, #tpu.memory_space<vmem>>, vector<1x1x1x128xf32>
    %17 = vector.shape_cast %16 : vector<1x1x1x128xf32> to vector<1x128xf32>
    %cst_15 = arith.constant 0.000000e+00 : f32
    %18 = vector.broadcast %cst_15 : f32 to vector<1x128xf32>
    %19 = arith.maximumf %17, %18 : vector<1x128xf32>
    %20 = arith.addf %15, %19 : vector<1x128xf32>
    %c0_16 = arith.constant 0 : index
    %c4 = arith.constant 4 : index
    %c0_17 = arith.constant 0 : index
    %c0_18 = arith.constant 0 : index
    %21 = vector.load %arg2[%c0_16, %c4, %c0_17, %c0_18] : memref<2x6x1x128xf32, #tpu.memory_space<vmem>>, vector<1x1x1x128xf32>
    %22 = vector.shape_cast %21 : vector<1x1x1x128xf32> to vector<1x128xf32>
    %cst_19 = arith.constant 0.000000e+00 : f32
    %23 = vector.broadcast %cst_19 : f32 to vector<1x128xf32>
    %24 = arith.maximumf %22, %23 : vector<1x128xf32>
    %25 = arith.addf %20, %24 : vector<1x128xf32>
    %c0_20 = arith.constant 0 : index
    %c5 = arith.constant 5 : index
    %c0_21 = arith.constant 0 : index
    %c0_22 = arith.constant 0 : index
    %26 = vector.load %arg2[%c0_20, %c5, %c0_21, %c0_22] : memref<2x6x1x128xf32, #tpu.memory_space<vmem>>, vector<1x1x1x128xf32>
    %27 = vector.shape_cast %26 : vector<1x1x1x128xf32> to vector<1x128xf32>
    %cst_23 = arith.constant 0.000000e+00 : f32
    %28 = vector.broadcast %cst_23 : f32 to vector<1x128xf32>
    %29 = arith.maximumf %27, %28 : vector<1x128xf32>
    %30 = arith.addf %25, %29 : vector<1x128xf32>
    %c1_24 = arith.constant 1 : index
    %c0_25 = arith.constant 0 : index
    %c0_26 = arith.constant 0 : index
    %c0_27 = arith.constant 0 : index
    %31 = vector.load %arg2[%c1_24, %c0_25, %c0_26, %c0_27] : memref<2x6x1x128xf32, #tpu.memory_space<vmem>>, vector<1x1x1x128xf32>
    %32 = vector.shape_cast %31 : vector<1x1x1x128xf32> to vector<1x128xf32>
    %cst_28 = arith.constant 0.000000e+00 : f32
    %33 = vector.broadcast %cst_28 : f32 to vector<1x128xf32>
    %34 = arith.maximumf %32, %33 : vector<1x128xf32>
    %c1_29 = arith.constant 1 : index
    %c1_30 = arith.constant 1 : index
    %c0_31 = arith.constant 0 : index
    %c0_32 = arith.constant 0 : index
    %35 = vector.load %arg2[%c1_29, %c1_30, %c0_31, %c0_32] : memref<2x6x1x128xf32, #tpu.memory_space<vmem>>, vector<1x1x1x128xf32>
    %36 = vector.shape_cast %35 : vector<1x1x1x128xf32> to vector<1x128xf32>
    %cst_33 = arith.constant 0.000000e+00 : f32
    %37 = vector.broadcast %cst_33 : f32 to vector<1x128xf32>
    %38 = arith.maximumf %36, %37 : vector<1x128xf32>
    %c1_34 = arith.constant 1 : index
    %c2_35 = arith.constant 2 : index
    %c0_36 = arith.constant 0 : index
    %c0_37 = arith.constant 0 : index
    %39 = vector.load %arg2[%c1_34, %c2_35, %c0_36, %c0_37] : memref<2x6x1x128xf32, #tpu.memory_space<vmem>>, vector<1x1x1x128xf32>
    %40 = vector.shape_cast %39 : vector<1x1x1x128xf32> to vector<1x128xf32>
    %cst_38 = arith.constant 0.000000e+00 : f32
    %41 = vector.broadcast %cst_38 : f32 to vector<1x128xf32>
    %42 = arith.maximumf %40, %41 : vector<1x128xf32>
    %c1_39 = arith.constant 1 : index
    %c3_40 = arith.constant 3 : index
    %c0_41 = arith.constant 0 : index
    %c0_42 = arith.constant 0 : index
    %43 = vector.load %arg2[%c1_39, %c3_40, %c0_41, %c0_42] : memref<2x6x1x128xf32, #tpu.memory_space<vmem>>, vector<1x1x1x128xf32>
    %44 = vector.shape_cast %43 : vector<1x1x1x128xf32> to vector<1x128xf32>
    %cst_43 = arith.constant 0.000000e+00 : f32
    %45 = vector.broadcast %cst_43 : f32 to vector<1x128xf32>
    %46 = arith.maximumf %44, %45 : vector<1x128xf32>
    %c1_44 = arith.constant 1 : index
    %c4_45 = arith.constant 4 : index
    %c0_46 = arith.constant 0 : index
    %c0_47 = arith.constant 0 : index
    %47 = vector.load %arg2[%c1_44, %c4_45, %c0_46, %c0_47] : memref<2x6x1x128xf32, #tpu.memory_space<vmem>>, vector<1x1x1x128xf32>
    %48 = vector.shape_cast %47 : vector<1x1x1x128xf32> to vector<1x128xf32>
    %cst_48 = arith.constant 0.000000e+00 : f32
    %49 = vector.broadcast %cst_48 : f32 to vector<1x128xf32>
    %50 = arith.maximumf %48, %49 : vector<1x128xf32>
    %c1_49 = arith.constant 1 : index
    %c5_50 = arith.constant 5 : index
    %c0_51 = arith.constant 0 : index
    %c0_52 = arith.constant 0 : index
    %51 = vector.load %arg2[%c1_49, %c5_50, %c0_51, %c0_52] : memref<2x6x1x128xf32, #tpu.memory_space<vmem>>, vector<1x1x1x128xf32>
    %52 = vector.shape_cast %51 : vector<1x1x1x128xf32> to vector<1x128xf32>
    %cst_53 = arith.constant 0.000000e+00 : f32
    %53 = vector.broadcast %cst_53 : f32 to vector<1x128xf32>
    %54 = arith.maximumf %52, %53 : vector<1x128xf32>
    %c0_54 = arith.constant 0 : index
    %c1_55 = arith.constant 1 : index
    %55 = memref.load %arg1[%c0_54, %c1_55] : memref<6x6xf32, #tpu.memory_space<smem>>
    %c1_56 = arith.constant 1 : index
    %c0_57 = arith.constant 0 : index
    %56 = memref.load %arg1[%c1_56, %c0_57] : memref<6x6xf32, #tpu.memory_space<smem>>
    %57 = arith.addf %55, %56 : f32
    %58 = arith.mulf %34, %38 : vector<1x128xf32>
    %59 = vector.broadcast %57 : f32 to vector<1x128xf32>
    %60 = arith.mulf %59, %58 : vector<1x128xf32>
    %c0_58 = arith.constant 0 : index
    %c2_59 = arith.constant 2 : index
    %61 = memref.load %arg1[%c0_58, %c2_59] : memref<6x6xf32, #tpu.memory_space<smem>>
    %c2_60 = arith.constant 2 : index
    %c0_61 = arith.constant 0 : index
    %62 = memref.load %arg1[%c2_60, %c0_61] : memref<6x6xf32, #tpu.memory_space<smem>>
    %63 = arith.addf %61, %62 : f32
    %64 = arith.mulf %34, %42 : vector<1x128xf32>
    %65 = vector.broadcast %63 : f32 to vector<1x128xf32>
    %66 = arith.mulf %65, %64 : vector<1x128xf32>
    %67 = arith.addf %60, %66 : vector<1x128xf32>
    %c0_62 = arith.constant 0 : index
    %c3_63 = arith.constant 3 : index
    %68 = memref.load %arg1[%c0_62, %c3_63] : memref<6x6xf32, #tpu.memory_space<smem>>
    %c3_64 = arith.constant 3 : index
    %c0_65 = arith.constant 0 : index
    %69 = memref.load %arg1[%c3_64, %c0_65] : memref<6x6xf32, #tpu.memory_space<smem>>
    %70 = arith.addf %68, %69 : f32
    %71 = arith.mulf %34, %46 : vector<1x128xf32>
    %72 = vector.broadcast %70 : f32 to vector<1x128xf32>
    %73 = arith.mulf %72, %71 : vector<1x128xf32>
    %74 = arith.addf %67, %73 : vector<1x128xf32>
    %c0_66 = arith.constant 0 : index
    %c4_67 = arith.constant 4 : index
    %75 = memref.load %arg1[%c0_66, %c4_67] : memref<6x6xf32, #tpu.memory_space<smem>>
    %c4_68 = arith.constant 4 : index
    %c0_69 = arith.constant 0 : index
    %76 = memref.load %arg1[%c4_68, %c0_69] : memref<6x6xf32, #tpu.memory_space<smem>>
    %77 = arith.addf %75, %76 : f32
    %78 = arith.mulf %34, %50 : vector<1x128xf32>
    %79 = vector.broadcast %77 : f32 to vector<1x128xf32>
    %80 = arith.mulf %79, %78 : vector<1x128xf32>
    %81 = arith.addf %74, %80 : vector<1x128xf32>
    %c0_70 = arith.constant 0 : index
    %c5_71 = arith.constant 5 : index
    %82 = memref.load %arg1[%c0_70, %c5_71] : memref<6x6xf32, #tpu.memory_space<smem>>
    %c5_72 = arith.constant 5 : index
    %c0_73 = arith.constant 0 : index
    %83 = memref.load %arg1[%c5_72, %c0_73] : memref<6x6xf32, #tpu.memory_space<smem>>
    %84 = arith.addf %82, %83 : f32
    %85 = arith.mulf %34, %54 : vector<1x128xf32>
    %86 = vector.broadcast %84 : f32 to vector<1x128xf32>
    %87 = arith.mulf %86, %85 : vector<1x128xf32>
    %88 = arith.addf %81, %87 : vector<1x128xf32>
    %c1_74 = arith.constant 1 : index
    %c2_75 = arith.constant 2 : index
    %89 = memref.load %arg1[%c1_74, %c2_75] : memref<6x6xf32, #tpu.memory_space<smem>>
    %c2_76 = arith.constant 2 : index
    %c1_77 = arith.constant 1 : index
    %90 = memref.load %arg1[%c2_76, %c1_77] : memref<6x6xf32, #tpu.memory_space<smem>>
    %91 = arith.addf %89, %90 : f32
    %92 = arith.mulf %38, %42 : vector<1x128xf32>
    %93 = vector.broadcast %91 : f32 to vector<1x128xf32>
    %94 = arith.mulf %93, %92 : vector<1x128xf32>
    %95 = arith.addf %88, %94 : vector<1x128xf32>
    %c1_78 = arith.constant 1 : index
    %c3_79 = arith.constant 3 : index
    %96 = memref.load %arg1[%c1_78, %c3_79] : memref<6x6xf32, #tpu.memory_space<smem>>
    %c3_80 = arith.constant 3 : index
    %c1_81 = arith.constant 1 : index
    %97 = memref.load %arg1[%c3_80, %c1_81] : memref<6x6xf32, #tpu.memory_space<smem>>
    %98 = arith.addf %96, %97 : f32
    %99 = arith.mulf %38, %46 : vector<1x128xf32>
    %100 = vector.broadcast %98 : f32 to vector<1x128xf32>
    %101 = arith.mulf %100, %99 : vector<1x128xf32>
    %102 = arith.addf %95, %101 : vector<1x128xf32>
    %c1_82 = arith.constant 1 : index
    %c4_83 = arith.constant 4 : index
    %103 = memref.load %arg1[%c1_82, %c4_83] : memref<6x6xf32, #tpu.memory_space<smem>>
    %c4_84 = arith.constant 4 : index
    %c1_85 = arith.constant 1 : index
    %104 = memref.load %arg1[%c4_84, %c1_85] : memref<6x6xf32, #tpu.memory_space<smem>>
    %105 = arith.addf %103, %104 : f32
    %106 = arith.mulf %38, %50 : vector<1x128xf32>
    %107 = vector.broadcast %105 : f32 to vector<1x128xf32>
    %108 = arith.mulf %107, %106 : vector<1x128xf32>
    %109 = arith.addf %102, %108 : vector<1x128xf32>
    %c1_86 = arith.constant 1 : index
    %c5_87 = arith.constant 5 : index
    %110 = memref.load %arg1[%c1_86, %c5_87] : memref<6x6xf32, #tpu.memory_space<smem>>
    %c5_88 = arith.constant 5 : index
    %c1_89 = arith.constant 1 : index
    %111 = memref.load %arg1[%c5_88, %c1_89] : memref<6x6xf32, #tpu.memory_space<smem>>
    %112 = arith.addf %110, %111 : f32
    %113 = arith.mulf %38, %54 : vector<1x128xf32>
    %114 = vector.broadcast %112 : f32 to vector<1x128xf32>
    %115 = arith.mulf %114, %113 : vector<1x128xf32>
    %116 = arith.addf %109, %115 : vector<1x128xf32>
    %c2_90 = arith.constant 2 : index
    %c3_91 = arith.constant 3 : index
    %117 = memref.load %arg1[%c2_90, %c3_91] : memref<6x6xf32, #tpu.memory_space<smem>>
    %c3_92 = arith.constant 3 : index
    %c2_93 = arith.constant 2 : index
    %118 = memref.load %arg1[%c3_92, %c2_93] : memref<6x6xf32, #tpu.memory_space<smem>>
    %119 = arith.addf %117, %118 : f32
    %120 = arith.mulf %42, %46 : vector<1x128xf32>
    %121 = vector.broadcast %119 : f32 to vector<1x128xf32>
    %122 = arith.mulf %121, %120 : vector<1x128xf32>
    %123 = arith.addf %116, %122 : vector<1x128xf32>
    %c2_94 = arith.constant 2 : index
    %c4_95 = arith.constant 4 : index
    %124 = memref.load %arg1[%c2_94, %c4_95] : memref<6x6xf32, #tpu.memory_space<smem>>
    %c4_96 = arith.constant 4 : index
    %c2_97 = arith.constant 2 : index
    %125 = memref.load %arg1[%c4_96, %c2_97] : memref<6x6xf32, #tpu.memory_space<smem>>
    %126 = arith.addf %124, %125 : f32
    %127 = arith.mulf %42, %50 : vector<1x128xf32>
    %128 = vector.broadcast %126 : f32 to vector<1x128xf32>
    %129 = arith.mulf %128, %127 : vector<1x128xf32>
    %130 = arith.addf %123, %129 : vector<1x128xf32>
    %c2_98 = arith.constant 2 : index
    %c5_99 = arith.constant 5 : index
    %131 = memref.load %arg1[%c2_98, %c5_99] : memref<6x6xf32, #tpu.memory_space<smem>>
    %c5_100 = arith.constant 5 : index
    %c2_101 = arith.constant 2 : index
    %132 = memref.load %arg1[%c5_100, %c2_101] : memref<6x6xf32, #tpu.memory_space<smem>>
    %133 = arith.addf %131, %132 : f32
    %134 = arith.mulf %42, %54 : vector<1x128xf32>
    %135 = vector.broadcast %133 : f32 to vector<1x128xf32>
    %136 = arith.mulf %135, %134 : vector<1x128xf32>
    %137 = arith.addf %130, %136 : vector<1x128xf32>
    %c3_102 = arith.constant 3 : index
    %c4_103 = arith.constant 4 : index
    %138 = memref.load %arg1[%c3_102, %c4_103] : memref<6x6xf32, #tpu.memory_space<smem>>
    %c4_104 = arith.constant 4 : index
    %c3_105 = arith.constant 3 : index
    %139 = memref.load %arg1[%c4_104, %c3_105] : memref<6x6xf32, #tpu.memory_space<smem>>
    %140 = arith.addf %138, %139 : f32
    %141 = arith.mulf %46, %50 : vector<1x128xf32>
    %142 = vector.broadcast %140 : f32 to vector<1x128xf32>
    %143 = arith.mulf %142, %141 : vector<1x128xf32>
    %144 = arith.addf %137, %143 : vector<1x128xf32>
    %c3_106 = arith.constant 3 : index
    %c5_107 = arith.constant 5 : index
    %145 = memref.load %arg1[%c3_106, %c5_107] : memref<6x6xf32, #tpu.memory_space<smem>>
    %c5_108 = arith.constant 5 : index
    %c3_109 = arith.constant 3 : index
    %146 = memref.load %arg1[%c5_108, %c3_109] : memref<6x6xf32, #tpu.memory_space<smem>>
    %147 = arith.addf %145, %146 : f32
    %148 = arith.mulf %46, %54 : vector<1x128xf32>
    %149 = vector.broadcast %147 : f32 to vector<1x128xf32>
    %150 = arith.mulf %149, %148 : vector<1x128xf32>
    %151 = arith.addf %144, %150 : vector<1x128xf32>
    %c4_110 = arith.constant 4 : index
    %c5_111 = arith.constant 5 : index
    %152 = memref.load %arg1[%c4_110, %c5_111] : memref<6x6xf32, #tpu.memory_space<smem>>
    %c5_112 = arith.constant 5 : index
    %c4_113 = arith.constant 4 : index
    %153 = memref.load %arg1[%c5_112, %c4_113] : memref<6x6xf32, #tpu.memory_space<smem>>
    %154 = arith.addf %152, %153 : f32
    %155 = arith.mulf %50, %54 : vector<1x128xf32>
    %156 = vector.broadcast %154 : f32 to vector<1x128xf32>
    %157 = arith.mulf %156, %155 : vector<1x128xf32>
    %158 = arith.addf %151, %157 : vector<1x128xf32>
    %159 = arith.addf %30, %158 : vector<1x128xf32>
    %c0_114 = arith.constant 0 : index
    %c0_115 = arith.constant 0 : index
    %160 = vector.load %arg3[%c0_114, %c0_115] : memref<1x128xf32, #tpu.memory_space<vmem>>, vector<1x128xf32>
    tpu.vector_store %arg3[%c0_114, %c0_115], %159 {strides = array<i32>} : memref<1x128xf32, #tpu.memory_space<vmem>>, vector<1x128xf32>,
    return
  }
  func.func @transform_0(%arg0: i32) -> (i32, i32) {
    %c0_i32 = arith.constant 0 : i32
    %c0_i32_0 = arith.constant 0 : i32
    %c0_i32_1 = arith.constant 0 : i32
    return %c0_i32, %c0_i32_0 : i32, i32
  }
  func.func @transform_1(%arg0: i32) -> (i32, i32, i32, i32) {
    %c0_i32 = arith.constant 0 : i32
    %c0_i32_0 = arith.constant 0 : i32
    %c0_i32_1 = arith.constant 0 : i32
    %c0_i32_2 = arith.constant 0 : i32
    return %c0_i32, %c0_i32_0, %arg0, %c0_i32_1 : i32, i32, i32, i32
  }
  func.func @transform_2(%arg0: i32) -> (i32, i32) {
    %c0_i32 = arith.constant 0 : i32
    %c0_i32_0 = arith.constant 0 : i32
    return %arg0, %c0_i32 : i32, i32
  }
}

</mosaic_0001>

<bundles_post_ra>
// kernel: cooperation_forward.1
= control target key start
LH: loop header
LB: loop body
LE: loop exit
PB: predicated region body
PF: predicated region fallthrough
CT: control target
= control target key end

     0   :  { %7 = vsyncpa [#allocation3], 0  ;;  %s394_s0 = inlined_call_operand.vmem [shape: f32[6,6], index: 0, kind: input, shape index: {}]   ;;  %s395_s1 = inlined_call_operand.vmem [shape: f32[2,6,1,128], index: 1, kind: input, shape index: {}]   ;;  %s396_s2 = inlined_call_operand.vmem [shape: f32[1,128], index: 2, kind: output, shape index: {}]  }
   0x1   :  { %s14_s11 = sshll.u32 %s394_s0, 4  ;;  %s15_s11 = int_to_ptr.vmem [resolvable:$true] %s14_s11 }
   0x2   :  { %s218_s12 = scalar_lea.vmem %s15_s11, 128  ;;  %p223_p1 = scmp.lt.s32.totalorder %s15_s11, %s15_s11 }
   0x3   :  { %p219_p0 = scmp.ne.s32.totalorder %s15_s11, %s218_s12  ;;  %p224_p2 = scmp.lt.s32.totalorder %s218_s12, %s218_s12 }
   0x5   :  { %p225_p3 = por %p224_p2, %p223_p1 }
   0x7   :  { %p226_p4 = pnand %p225_p3, %p219_p0 }
   0x9   :  { %229 = shalt.err (!%p226_p4)
}
   0xa   :  { %s232_s13 = smov [#allocation2]  }
   0xb   :  { %17 = dma.vmem_to_smem %s15_s11, 128, %s232_s13, [#allocation3]  }
   0xc   :  { %230 = dma.done.wait [#allocation3], 128  }
   0xd   :  { %231 = vsyncadd [#allocation3], 4294967168 }
   0xe   :  { %23 = sfence }
   0xf   :  { %v181_v0 = vld [vmem:[%s395_s1 + $0x6] sm:$0x1]  ;;  %v182_v1 = vld [vmem:[%s395_s1 + $0x7] sm:$0x1]  ;;  %v183_v2 = vld [vmem:[%s395_s1 + $0x8] sm:$0x1] }
  0x10   :  { %v184_v3 = vld [vmem:[%s395_s1 + $0x9] sm:$0x1]  ;;  %v49_v4 = vmax.f32 %v181_v0, 0.0  ;;  %v263_v5 = vmax.f32 %v182_v1, 0.0  ;;  %s187_s21 = sld [smem:[#allocation2 + $0x1]]  ;;  %s188_s22 = sld [smem:[#allocation2 + $0x80]] }
  0x11   :  { %v185_v6 = vld [vmem:[%s395_s1 + $0xa] sm:$0x1]  ;;  %s189_s25 = sld [smem:[#allocation2 + $0x2]]  ;;  %s190_s26 = sld [smem:[#allocation2 + $0x100]]  ;;  %v268_v7 = vmax.f32 %v183_v2, 0.0  ;;  %v270_v8 = vmax.f32 %v184_v3, 0.0 }
  0x12   :  { %s191_s27 = sld [smem:[#allocation2 + $0x3]]  ;;  %s192_s28 = sld [smem:[#allocation2 + $0x180]]  ;;  %v186_v9 = vld [vmem:[%s395_s1 + $0xb] sm:$0x1]  ;;  %v277_v10 = vmax.f32 %v185_v6, 0.0  ;;  %v68_v11 = vmul.f32 %v263_v5, %v49_v4 }
  0x13   :  { %s275_s3 = sld [smem:[#allocation2 + $0x4]]  ;;  %s194_s4 = sld [smem:[#allocation2 + $0x200]]  ;;  %v288_v12 = vmax.f32 %v186_v9, 0.0  ;;  %v74_v13 = vmul.f32 %v268_v7, %v49_v4  ;;  %v81_v14 = vmul.f32 %v270_v8, %v49_v4  ;;  %v24_v24 = vld [vmem:[%s395_s1] sm:$0x1]  ;;  %v102_v28 = vmul.f32 %v268_v7, %v263_v5 }
  0x14   :  { %s279_s5 = sld [smem:[#allocation2 + $0x5]]  ;;  %s281_s6 = sld [smem:[#allocation2 + $0x280]]  ;;  %v88_v16 = vmul.f32 %v277_v10, %v49_v4  ;;  %v176_v29 = vld [vmem:[%s395_s1 + $0x1] sm:$0x1]  ;;  %v109_v33 = vmul.f32 %v270_v8, %v263_v5  ;;  %v25_v34 = vmax.f32 %v24_v24, 0.0  ;;  %v116_v40 = vmul.f32 %v277_v10, %v263_v5 }
  0x15   :  { %s284_s7 = sld [smem:[#allocation2 + $0x82]]  ;;  %s286_s8 = sld [smem:[#allocation2 + $0x101]]  ;;  %v95_v21 = vmul.f32 %v288_v12, %v49_v4  ;;  %v177_v35 = vld [vmem:[%s395_s1 + $0x2] sm:$0x1]  ;;  %v29_v37 = vmax.f32 %v176_v29, 0.0  ;;  %v123_v44 = vmul.f32 %v288_v12, %v263_v5  ;;  %v130_v51 = vmul.f32 %v270_v8, %v268_v7 }
  0x16   :  { %s67_s9 = sadd.f32 %s188_s22, %s187_s21  ;;  %s291_s10 = sld [smem:[#allocation2 + $0x83]]  ;;  %v33_v45 = vmax.f32 %v177_v35, 0.0  ;;  %v178_v48 = vld [vmem:[%s395_s1 + $0x3] sm:$0x1]  ;;  %v137_v55 = vmul.f32 %v277_v10, %v268_v7  ;;  %v179_v59 = vld [vmem:[%s395_s1 + $0x4] sm:$0x1]  ;;  %v144_v62 = vmul.f32 %v288_v12, %v268_v7  ;;  %v151_v2 = vmul.f32 %v277_v10, %v270_v8 }
  0x17   :  { %s73_s11 = sadd.f32 %s190_s26, %s189_s25  ;;  %s294_s12 = sld [smem:[#allocation2 + $0x181]]  ;;  %v30_v47 = vadd.f32 %v29_v37, %v25_v34  ;;  %v37_v56 = vmax.f32 %v178_v48, 0.0  ;;  %v41_v3 = vmax.f32 %v179_v59, 0.0  ;;  %v180_v7 = vld [vmem:[%s395_s1 + $0x5] sm:$0x1] }
  0x18   :  { %v69_v15 = vstv %s67_s9  ;;  %s80_s13 = sadd.f32 %s192_s28, %s191_s27  ;;  %s297_s14 = sld [smem:[#allocation2 + $0x84]] }
  0x19   :  { %v70_v17 = vmul.f32 %v69_v15, %v68_v11  ;;  %v75_v18 = vstv %s73_s11  ;;  %s87_s15 = sadd.f32 %s194_s4, %s275_s3  ;;  %s300_s16 = sld [smem:[#allocation2 + $0x201]]  ;;  %v34_v58 = vadd.f32 %v33_v45, %v30_v47  ;;  %v158_v11 = vmul.f32 %v288_v12, %v270_v8 }
  0x1a   :  { %v76_v19 = vmul.f32 %v75_v18, %v74_v13  ;;  %v82_v20 = vstv %s80_s13  ;;  %s94_s17 = sadd.f32 %s281_s6, %s279_s5  ;;  %s305_s0 = sld [smem:[#allocation2 + $0x85]] }
  0x1b   :  { %v83_v22 = vmul.f32 %v82_v20, %v81_v14  ;;  %v89_v23 = vstv %s87_s15  ;;  %s101_s18 = sadd.f32 %s286_s8, %s284_s7  ;;  %s309_s19 = sld [smem:[#allocation2 + $0x281]]  ;;  %v38_v5 = vadd.f32 %v37_v56, %v34_v58 }
  0x1c   :  { %v77_v25 = vadd.f32 %v76_v19, %v70_v17  ;;  %v90_v26 = vmul.f32 %v89_v23, %v88_v16  ;;  %v96_v27 = vstv %s94_s17  ;;  %s316_s22 = sld [smem:[#allocation2 + $0x103]]  ;;  %s318_s23 = sld [smem:[#allocation2 + $0x182]]  ;;  %v165_v16 = vmul.f32 %v288_v12, %v277_v10 }
  0x1d   :  { %v103_v30 = vstv %s101_s18  ;;  %s108_s26 = sadd.f32 %s294_s12, %s291_s10  ;;  %s325_s27 = sld [smem:[#allocation2 + $0x104]]  ;;  %v97_v32 = vmul.f32 %v96_v27, %v95_v21  ;;  %v42_v18 = vadd.f32 %v41_v3, %v38_v5  ;;  %v45_v19 = vmax.f32 %v180_v7, 0.0 }
  0x1e   :  { %v84_v31 = vadd.f32 %v83_v22, %v77_v25  ;;  %s329_s28 = sld [smem:[#allocation2 + $0x202]]  ;;  %s331_s29 = sld [smem:[#allocation2 + $0x105]]  ;;  %v104_v39 = vmul.f32 %v103_v30, %v102_v28 }
  0x1f   :  { %v110_v36 = vstv %s108_s26  ;;  %s115_s4 = sadd.f32 %s300_s16, %s297_s14  ;;  %s338_s5 = sld [smem:[#allocation2 + $0x282]]  ;;  %v46_v24 = vadd.f32 %v45_v19, %v42_v18 }
  0x20   :  { %v91_v38 = vadd.f32 %v90_v26, %v84_v31  ;;  %s342_s6 = sld [smem:[#allocation2 + $0x184]]  ;;  %s344_s7 = sld [smem:[#allocation2 + $0x203]]  ;;  %v111_v43 = vmul.f32 %v110_v36, %v109_v33 }
  0x21   :  { %v117_v41 = vstv %s115_s4  ;;  %s122_s8 = sadd.f32 %s309_s19, %s305_s0  ;;  %s348_s9 = sld [smem:[#allocation2 + $0x185]] }
  0x22   :  { %v98_v42 = vadd.f32 %v97_v32, %v91_v38  ;;  %s129_s10 = sadd.f32 %s318_s23, %s316_s22  ;;  %s354_s11 = sld [smem:[#allocation2 + $0x283]]  ;;  %v118_v50 = vmul.f32 %v117_v41, %v116_v40 }
  0x23   :  { %v124_v46 = vstv %s122_s8  ;;  %s356_s12 = sld [smem:[#allocation2 + $0x205]]  ;;  %s358_s13 = sld [smem:[#allocation2 + $0x284]] }
  0x24   :  { %v105_v49 = vadd.f32 %v104_v39, %v98_v42  ;;  %s136_s16 = sadd.f32 %s329_s28, %s325_s27  ;;  %v131_v52 = vstv %s129_s10  ;;  %v125_v54 = vmul.f32 %v124_v46, %v123_v44 }
  0x25   :  { %s143_s17 = sadd.f32 %s338_s5, %s331_s29  ;;  %v132_v61 = vmul.f32 %v131_v52, %v130_v51 }
  0x26   :  { %v112_v53 = vadd.f32 %v111_v43, %v105_v49  ;;  %v138_v57 = vstv %s136_s16  ;;  %s150_s0 = sadd.f32 %s344_s7, %s342_s6 }
  0x27   :  { %v145_v63 = vstv %s143_s17  ;;  %v139_v1 = vmul.f32 %v138_v57, %v137_v55 }
  0x28   :  { %v119_v60 = vadd.f32 %v118_v50, %v112_v53  ;;  %s157_s20 = sadd.f32 %s354_s11, %s348_s9  ;;  %v152_v4 = vstv %s150_s0  ;;  %v146_v9 = vmul.f32 %v145_v63, %v144_v62 }
  0x29   :  { %s164_s21 = sadd.f32 %s358_s13, %s356_s12  ;;  %v153_v15 = vmul.f32 %v152_v4, %v151_v2 }
  0x2a   :  { %v126_v0 = vadd.f32 %v125_v54, %v119_v60  ;;  %v159_v13 = vstv %s157_s20 }
  0x2b   :  { %v166_v17 = vstv %s164_s21  ;;  %v160_v21 = vmul.f32 %v159_v13, %v158_v11 }
  0x2c   :  { %v133_v6 = vadd.f32 %v132_v61, %v126_v0  ;;  %v167_v23 = vmul.f32 %v166_v17, %v165_v16 }
  0x2e   :  { %v140_v14 = vadd.f32 %v139_v1, %v133_v6 }
  0x30   :  { %v147_v20 = vadd.f32 %v146_v9, %v140_v14 }
  0x32   :  { %v154_v22 = vadd.f32 %v153_v15, %v147_v20 }
  0x34   :  { %v161_v25 = vadd.f32 %v160_v21, %v154_v22 }
  0x36   :  { %v168_v8 = vadd.f32 %v167_v23, %v161_v25 }
  0x38   :  { %v169_v26 = vadd.f32 %v168_v8, %v46_v24 }
  0x3a   :  { %170 = vst [vmem:[%s396_s2] sm:$0x1] %v169_v26 }
  0x3b   :  { %175 = vsyncpa [#allocation3], 1 }

</bundles_post_ra>
